<compile_context>
chip_gen: v6e
topology: v6e:2x2x1
jax: 0.10.0
libtpu: 0.0.40
codegen_flags: <defaults>
</compile_context>

<pallas_src>
import math
from functools import partial

import jax
import jax.numpy as jnp
from jax import lax
from jax.experimental import pallas as pl
from jax.experimental.pallas import tpu as pltpu


def _mha_kernel(x_ref, wqkv_ref, bqkv_ref, wo_ref, bo_ref, o_ref, ctx_ref, *,
                batch, n_heads, head_size):
    M, E = x_ref.shape                       # M = B * S
    S = M // batch

    x = x_ref[...].astype(jnp.bfloat16)      # (M, E)

    # Fused QKV projection: one MXU matmul, M = B*S rows, N = 3E columns,
    # f32 accumulation. 1/sqrt(Dh) is already folded into the Q columns of
    # wqkv and bqkv (done once in prepare_params).
    qkv = jnp.dot(x, wqkv_ref[...],
                  preferred_element_type=jnp.float32) + bqkv_ref[...]   # (M, 3E)

    # Causal mask for one (S, S) score tile, shared by every (batch, head)
    # pair. Finite large-negative instead of -inf so a fully-masked row can
    # never produce NaNs.
    row = lax.broadcasted_iota(jnp.int32, (S, S), 0)
    col = lax.broadcasted_iota(jnp.int32, (S, S), 1)
    causal = col > row
    neg_big = jnp.float32(-1e30)

    # Per-(batch, head) attention. Static Python loop over B*H tiny tiles;
    # all slices are static. Each head's context is written straight into the
    # ctx scratch ref at its column slice (no concatenate, bounded live
    # ranges).
    for b in range(batch):
        r0 = b * S
        for h in range(n_heads):
            lo = h * head_size
            hi = lo + head_size
            q_h = qkv[r0:r0 + S, 0 * E + lo:0 * E + hi].astype(jnp.bfloat16)
            k_h = qkv[r0:r0 + S, 1 * E + lo:1 * E + hi].astype(jnp.bfloat16)
            v_h = qkv[r0:r0 + S, 2 * E + lo:2 * E + hi].astype(jnp.bfloat16)

            # q_h @ k_h^T without an explicit transpose: contract last dims.
            s = lax.dot_general(q_h, k_h, (((1,), (1,)), ((), ())),
                                preferred_element_type=jnp.float32)     # (S, S)
            s = jnp.where(causal, neg_big, s)

            # Numerically stable softmax along keys; reciprocal on the EUP.
            m = jnp.max(s, axis=-1, keepdims=True)
            p = jnp.exp(s - m)
            denom = jnp.sum(p, axis=-1, keepdims=True)
            attn = p * pl.reciprocal(denom, approx=True)
            # TODO(synk): nn.Dropout on attention weights is identity in eval
            # mode; training-mode dropout is not implemented here.

            ctx_ref[r0:r0 + S, lo:hi] = jnp.dot(
                attn.astype(jnp.bfloat16), v_h,
                preferred_element_type=jnp.float32)                     # (S, Dh)

    # Output projection over all M rows at once; single lane/sublane-dense
    # (M, E) store into the output block.
    ctx = ctx_ref[...].astype(jnp.bfloat16)                             # (M, E)
    out = jnp.dot(ctx, wo_ref[...],
                  preferred_element_type=jnp.float32) + bo_ref[...]     # (M, E)
    o_ref[...] = out.astype(o_ref.dtype)


def prepare_params(params, n_heads):
    """One-time weight preparation (call once, outside the per-forward path).

    Fuses wq/wk/wv into one (E, 3E) bf16 operand, folds 1/sqrt(Dh) into the
    Q columns of the weight AND bias (the torch scale applies after the bias
    add, so both must be scaled), and casts the output projection to bf16.
    """
    E = params["wq"].shape[0]
    scale = 1.0 / math.sqrt(E // n_heads)
    wqkv = jnp.concatenate(
        [params["wq"] * scale, params["wk"], params["wv"]],
        axis=1).astype(jnp.bfloat16)                                    # (E, 3E)
    bqkv = jnp.concatenate(
        [params["bq"] * scale, params["bk"], params["bv"]],
        axis=1).astype(jnp.float32)                                     # (1, 3E)
    return {
        "wqkv": wqkv,
        "bqkv": bqkv,
        "wo": params["wo"].astype(jnp.bfloat16),                        # (E, E)
        "bo": params["bo"].astype(jnp.float32),                         # (1, E)
    }


def multi_head_attention(x, prep, n_heads):
    """x: (B, S, E) float32. `prep` is the output of prepare_params()."""
    B, S, E = x.shape
    M = B * S
    head_size = E // n_heads

    # Flatten (B, S) -> M so the projections see M = B*S rows and the whole
    # problem runs in a single grid step (overhead/latency-bound regime at
    # this toy size). The reshape is a metadata-only op on a contiguous array.
    x_flat = x.reshape(M, E)

    kernel = partial(_mha_kernel, batch=B, n_heads=n_heads, head_size=head_size)

    out_flat = pl.pallas_call(
        kernel,
        out_shape=jax.ShapeDtypeStruct((M, E), x.dtype),
        grid_spec=pltpu.PrefetchScalarGridSpec(
            num_scalar_prefetch=0,
            grid=(1,),
            in_specs=[
                pl.BlockSpec((M, E), lambda i: (0, 0)),          # x (flattened)
                pl.BlockSpec((E, 3 * E), lambda i: (0, 0)),      # fused, scaled W_qkv
                pl.BlockSpec((1, 3 * E), lambda i: (0, 0)),      # fused, scaled b_qkv
                pl.BlockSpec((E, E), lambda i: (0, 0)),          # W_o
                pl.BlockSpec((1, E), lambda i: (0, 0)),          # b_o
            ],
            out_specs=pl.BlockSpec((M, E), lambda i: (0, 0)),
            scratch_shapes=[pltpu.VMEM((M, E), jnp.float32)],    # ctx scratch
        ),
        # Single grid step; at realistic sizes split a 'parallel' axis over
        # heads / q-tiles so v7x megacore gets >= 2 steps (see TODO at top).
        compiler_params=pltpu.CompilerParams(
            dimension_semantics=("arbitrary",)),
    )(x_flat, prep["wqkv"], prep["bqkv"], prep["wo"], prep["bo"])

    return out_flat.reshape(B, S, E)


def _reference(x, params, n_heads):
    """Pure-JAX f32 reference mirroring the PyTorch forward (eval mode)."""
    B, S, E = x.shape
    Dh = E // n_heads

    def lin(t, w, b):
        return t @ w + b[0]

    q = lin(x, params["wq"], params["bq"]).reshape(B, S, n_heads, Dh).transpose(0, 2, 1, 3)
    k = lin(x, params["wk"], params["bk"]).reshape(B, S, n_heads, Dh).transpose(0, 2, 1, 3)
    v = lin(x, params["wv"], params["bv"]).reshape(B, S, n_heads, Dh).transpose(0, 2, 1, 3)
    scores = jnp.einsum("bhqd,bhkd->bhqk", q, k) / math.sqrt(Dh)
    mask = jnp.triu(jnp.ones((S, S), dtype=bool), k=1)
    scores = jnp.where(mask, -jnp.inf, scores)
    attn = jax.nn.softmax(scores, axis=-1)
    ctx = jnp.einsum("bhqk,bhkd->bhqd", attn, v)
    ctx = ctx.transpose(0, 2, 1, 3).reshape(B, S, E)
    return lin(ctx, params["wo"], params["bo"])


def _init_params(key, n_embd):
    """Deterministic nn.Linear-style init: U(-1/sqrt(in), 1/sqrt(in))."""
    bound = 1.0 / math.sqrt(n_embd)
    keys = jax.random.split(key, 8)

    def w(k):  # stored transposed: (E_in, E_out) so y = x @ W + b
        return jax.random.uniform(k, (n_embd, n_embd), jnp.float32, -bound, bound)

    def b(k):  # stored as (1, E) for clean VMEM tiling
        return jax.random.uniform(k, (1, n_embd), jnp.float32, -bound, bound)

    return {
        "wq": w(keys[0]), "bq": b(keys[1]),
        "wk": w(keys[2]), "bk": b(keys[3]),
        "wv": w(keys[4]), "bv": b(keys[5]),
        "wo": w(keys[6]), "bo": b(keys[7]),
    }


if __name__ == "__main__":
    # Small config implied by the module: n_embd=32, n_heads=4, seq=8, batch=2.
    B, S, E, H = 2, 8, 32, 4

    key = jax.random.PRNGKey(0)
    kx, kp = jax.random.split(key)
    x = jax.random.normal(kx, (B, S, E), jnp.float32)
    params = _init_params(kp, E)

    # One-time weight prep (fuse + bf16 cast + scale fold) outside the
    # per-forward path.
    prep = jax.tree_util.tree_map(jax.block_until_ready,
                                  prepare_params(params, H))

    out = jax.block_until_ready(multi_head_attention(x, prep, n_heads=H))
    ref = _reference(x, params, n_heads=H)

    assert out.shape == (B, S, E)
    # Tolerance sized for bf16 MXU operands with f32 accumulation.
    max_err = float(jnp.max(jnp.abs(out - ref)))
    assert jnp.allclose(out, ref, atol=5e-2, rtol=5e-2), (
        f"mismatch vs reference, max abs err = {max_err}")

    print("KERNEL_OK")
</pallas_src>

<mosaic_0001>
module attributes {stable_mosaic.version = 11 : i64} {
  func.func @_mha_kernel(%arg0: i32, %arg1: memref<16x32xf32, #tpu.memory_space<vmem>>, %arg2: memref<32x96xbf16, #tpu.memory_space<vmem>>, %arg3: memref<1x96xf32, #tpu.memory_space<vmem>>, %arg4: memref<32x32xbf16, #tpu.memory_space<vmem>>, %arg5: memref<1x32xf32, #tpu.memory_space<vmem>>, %arg6: memref<16x32xf32, #tpu.memory_space<vmem>>, %arg7: memref<16x32xf32, #tpu.memory_space<vmem>>) attributes {dimension_semantics = [#tpu.dimension_semantics<arbitrary>], iteration_bounds = array<i64: 1>, scalar_prefetch = 0 : i64, scratch_operands = 1 : i64, tpu.core_type = #tpu.core_type<tc>, window_params = [{pipeline_mode = #tpu.pipeline_mode<synchronous>, transform_indices = @transform_0, window_bounds = array<i64: 16, 32>}, {pipeline_mode = #tpu.pipeline_mode<synchronous>, transform_indices = @transform_1, window_bounds = array<i64: 32, 96>}, {pipeline_mode = #tpu.pipeline_mode<synchronous>, transform_indices = @transform_2, window_bounds = array<i64: 1, 96>}, {pipeline_mode = #tpu.pipeline_mode<synchronous>, transform_indices = @transform_3, window_bounds = array<i64: 32, 32>}, {pipeline_mode = #tpu.pipeline_mode<synchronous>, transform_indices = @transform_4, window_bounds = array<i64: 1, 32>}, {pipeline_mode = #tpu.pipeline_mode<synchronous>, transform_indices = @transform_5, window_bounds = array<i64: 16, 32>}]} {
    %c0 = arith.constant 0 : index
    %c0_0 = arith.constant 0 : index
    %0 = vector.load %arg1[%c0, %c0_0] : memref<16x32xf32, #tpu.memory_space<vmem>>, vector<16x32xf32>
    %1 = arith.truncf %0 : vector<16x32xf32> to vector<16x32xbf16>
    %c0_1 = arith.constant 0 : index
    %c0_2 = arith.constant 0 : index
    %2 = vector.load %arg2[%c0_1, %c0_2] : memref<32x96xbf16, #tpu.memory_space<vmem>>, vector<32x96xbf16>
    %cst = arith.constant dense<0.000000e+00> : vector<16x96xf32>
    %3 = tpu.matmul %1, %2, %cst {dimension_numbers = #tpu.dot_dimension_numbers<[1], [0], [0], [1], [0, 0, 1, 1], [], []>} : vector<16x32xbf16>, vector<32x96xbf16>, vector<16x96xf32> -> vector<16x96xf32>
    %c0_3 = arith.constant 0 : index
    %c0_4 = arith.constant 0 : index
    %4 = vector.load %arg3[%c0_3, %c0_4] : memref<1x96xf32, #tpu.memory_space<vmem>>, vector<1x96xf32>
    %5 = vector.broadcast %4 : vector<1x96xf32> to vector<16x96xf32>
    %6 = arith.addf %3, %5 : vector<16x96xf32>
    %7 = tpu.iota {dimensions = array<i32: 0>} : vector<8x8xi32>
    %8 = tpu.iota {dimensions = array<i32: 1>} : vector<8x8xi32>
    %9 = arith.cmpi sgt, %8, %7 : vector<8x8xi32>
    %10 = vector.extract_strided_slice %6 {offsets = [0, 0], sizes = [8, 8], strides = [1, 1]} : vector<16x96xf32> to vector<8x8xf32>
    %11 = arith.truncf %10 : vector<8x8xf32> to vector<8x8xbf16>
    %12 = vector.extract_strided_slice %6 {offsets = [0, 32], sizes = [8, 8], strides = [1, 1]} : vector<16x96xf32> to vector<8x8xf32>
    %13 = arith.truncf %12 : vector<8x8xf32> to vector<8x8xbf16>
    %14 = vector.extract_strided_slice %6 {offsets = [0, 64], sizes = [8, 8], strides = [1, 1]} : vector<16x96xf32> to vector<8x8xf32>
    %15 = arith.truncf %14 : vector<8x8xf32> to vector<8x8xbf16>
    %cst_5 = arith.constant dense<0.000000e+00> : vector<8x8xf32>
    %16 = tpu.matmul %11, %13, %cst_5 {dimension_numbers = #tpu.dot_dimension_numbers<[1], [1], [0], [0], [0, 0, 1, 0], [], []>} : vector<8x8xbf16>, vector<8x8xbf16>, vector<8x8xf32> -> vector<8x8xf32>
    %cst_6 = arith.constant -1.000000e+30 : f32
    %17 = vector.broadcast %cst_6 : f32 to vector<8x8xf32>
    %18 = arith.select %9, %17, %16 : vector<8x8xi1>, vector<8x8xf32>
    %cst_7 = arith.constant dense<0xFF800000> : vector<8xf32>
    %19 = vector.multi_reduction <maximumf>, %18, %cst_7 [1] : vector<8x8xf32> to vector<8xf32>
    %20 = vector.shape_cast %19 : vector<8xf32> to vector<8x1xf32>
    %21 = vector.broadcast %20 : vector<8x1xf32> to vector<8x8xf32>
    %22 = arith.subf %18, %21 : vector<8x8xf32>
    %23 = math.exp %22 : vector<8x8xf32>
    %cst_8 = arith.constant dense<0.000000e+00> : vector<8xf32>
    %24 = vector.multi_reduction <add>, %23, %cst_8 [1] : vector<8x8xf32> to vector<8xf32>
    %25 = vector.shape_cast %24 : vector<8xf32> to vector<8x1xf32>
    %26 = tpu.reciprocal %25 {approx = true} : vector<8x1xf32> -> vector<8x1xf32>
    %27 = vector.broadcast %26 : vector<8x1xf32> to vector<8x8xf32>
    %28 = arith.mulf %23, %27 : vector<8x8xf32>
    %29 = arith.truncf %28 : vector<8x8xf32> to vector<8x8xbf16>
    %cst_9 = arith.constant dense<0.000000e+00> : vector<8x8xf32>
    %30 = tpu.matmul %29, %15, %cst_9 {dimension_numbers = #tpu.dot_dimension_numbers<[1], [0], [0], [1], [0, 0, 1, 1], [], []>} : vector<8x8xbf16>, vector<8x8xbf16>, vector<8x8xf32> -> vector<8x8xf32>
    %c0_10 = arith.constant 0 : index
    %c0_11 = arith.constant 0 : index
    %31 = vector.load %arg7[%c0_10, %c0_11] : memref<16x32xf32, #tpu.memory_space<vmem>>, vector<8x8xf32>
    tpu.vector_store %arg7[%c0_10, %c0_11], %30 {strides = array<i32>} : memref<16x32xf32, #tpu.memory_space<vmem>>, vector<8x8xf32>,
    %32 = vector.extract_strided_slice %6 {offsets = [0, 8], sizes = [8, 8], strides = [1, 1]} : vector<16x96xf32> to vector<8x8xf32>
    %33 = arith.truncf %32 : vector<8x8xf32> to vector<8x8xbf16>
    %34 = vector.extract_strided_slice %6 {offsets = [0, 40], sizes = [8, 8], strides = [1, 1]} : vector<16x96xf32> to vector<8x8xf32>
    %35 = arith.truncf %34 : vector<8x8xf32> to vector<8x8xbf16>
    %36 = vector.extract_strided_slice %6 {offsets = [0, 72], sizes = [8, 8], strides = [1, 1]} : vector<16x96xf32> to vector<8x8xf32>
    %37 = arith.truncf %36 : vector<8x8xf32> to vector<8x8xbf16>
    %cst_12 = arith.constant dense<0.000000e+00> : vector<8x8xf32>
    %38 = tpu.matmul %33, %35, %cst_12 {dimension_numbers = #tpu.dot_dimension_numbers<[1], [1], [0], [0], [0, 0, 1, 0], [], []>} : vector<8x8xbf16>, vector<8x8xbf16>, vector<8x8xf32> -> vector<8x8xf32>
    %cst_13 = arith.constant -1.000000e+30 : f32
    %39 = vector.broadcast %cst_13 : f32 to vector<8x8xf32>
    %40 = arith.select %9, %39, %38 : vector<8x8xi1>, vector<8x8xf32>
    %cst_14 = arith.constant dense<0xFF800000> : vector<8xf32>
    %41 = vector.multi_reduction <maximumf>, %40, %cst_14 [1] : vector<8x8xf32> to vector<8xf32>
    %42 = vector.shape_cast %41 : vector<8xf32> to vector<8x1xf32>
    %43 = vector.broadcast %42 : vector<8x1xf32> to vector<8x8xf32>
    %44 = arith.subf %40, %43 : vector<8x8xf32>
    %45 = math.exp %44 : vector<8x8xf32>
    %cst_15 = arith.constant dense<0.000000e+00> : vector<8xf32>
    %46 = vector.multi_reduction <add>, %45, %cst_15 [1] : vector<8x8xf32> to vector<8xf32>
    %47 = vector.shape_cast %46 : vector<8xf32> to vector<8x1xf32>
    %48 = tpu.reciprocal %47 {approx = true} : vector<8x1xf32> -> vector<8x1xf32>
    %49 = vector.broadcast %48 : vector<8x1xf32> to vector<8x8xf32>
    %50 = arith.mulf %45, %49 : vector<8x8xf32>
    %51 = arith.truncf %50 : vector<8x8xf32> to vector<8x8xbf16>
    %cst_16 = arith.constant dense<0.000000e+00> : vector<8x8xf32>
    %52 = tpu.matmul %51, %37, %cst_16 {dimension_numbers = #tpu.dot_dimension_numbers<[1], [0], [0], [1], [0, 0, 1, 1], [], []>} : vector<8x8xbf16>, vector<8x8xbf16>, vector<8x8xf32> -> vector<8x8xf32>
    %c0_17 = arith.constant 0 : index
    %c8 = arith.constant 8 : index
    %53 = vector.load %arg7[%c0_17, %c8] : memref<16x32xf32, #tpu.memory_space<vmem>>, vector<8x8xf32>
    tpu.vector_store %arg7[%c0_17, %c8], %52 {strides = array<i32>} : memref<16x32xf32, #tpu.memory_space<vmem>>, vector<8x8xf32>,
    %54 = vector.extract_strided_slice %6 {offsets = [0, 16], sizes = [8, 8], strides = [1, 1]} : vector<16x96xf32> to vector<8x8xf32>
    %55 = arith.truncf %54 : vector<8x8xf32> to vector<8x8xbf16>
    %56 = vector.extract_strided_slice %6 {offsets = [0, 48], sizes = [8, 8], strides = [1, 1]} : vector<16x96xf32> to vector<8x8xf32>
    %57 = arith.truncf %56 : vector<8x8xf32> to vector<8x8xbf16>
    %58 = vector.extract_strided_slice %6 {offsets = [0, 80], sizes = [8, 8], strides = [1, 1]} : vector<16x96xf32> to vector<8x8xf32>
    %59 = arith.truncf %58 : vector<8x8xf32> to vector<8x8xbf16>
    %cst_18 = arith.constant dense<0.000000e+00> : vector<8x8xf32>
    %60 = tpu.matmul %55, %57, %cst_18 {dimension_numbers = #tpu.dot_dimension_numbers<[1], [1], [0], [0], [0, 0, 1, 0], [], []>} : vector<8x8xbf16>, vector<8x8xbf16>, vector<8x8xf32> -> vector<8x8xf32>
    %cst_19 = arith.constant -1.000000e+30 : f32
    %61 = vector.broadcast %cst_19 : f32 to vector<8x8xf32>
    %62 = arith.select %9, %61, %60 : vector<8x8xi1>, vector<8x8xf32>
    %cst_20 = arith.constant dense<0xFF800000> : vector<8xf32>
    %63 = vector.multi_reduction <maximumf>, %62, %cst_20 [1] : vector<8x8xf32> to vector<8xf32>
    %64 = vector.shape_cast %63 : vector<8xf32> to vector<8x1xf32>
    %65 = vector.broadcast %64 : vector<8x1xf32> to vector<8x8xf32>
    %66 = arith.subf %62, %65 : vector<8x8xf32>
    %67 = math.exp %66 : vector<8x8xf32>
    %cst_21 = arith.constant dense<0.000000e+00> : vector<8xf32>
    %68 = vector.multi_reduction <add>, %67, %cst_21 [1] : vector<8x8xf32> to vector<8xf32>
    %69 = vector.shape_cast %68 : vector<8xf32> to vector<8x1xf32>
    %70 = tpu.reciprocal %69 {approx = true} : vector<8x1xf32> -> vector<8x1xf32>
    %71 = vector.broadcast %70 : vector<8x1xf32> to vector<8x8xf32>
    %72 = arith.mulf %67, %71 : vector<8x8xf32>
    %73 = arith.truncf %72 : vector<8x8xf32> to vector<8x8xbf16>
    %cst_22 = arith.constant dense<0.000000e+00> : vector<8x8xf32>
    %74 = tpu.matmul %73, %59, %cst_22 {dimension_numbers = #tpu.dot_dimension_numbers<[1], [0], [0], [1], [0, 0, 1, 1], [], []>} : vector<8x8xbf16>, vector<8x8xbf16>, vector<8x8xf32> -> vector<8x8xf32>
    %c0_23 = arith.constant 0 : index
    %c16 = arith.constant 16 : index
    %75 = vector.load %arg7[%c0_23, %c16] : memref<16x32xf32, #tpu.memory_space<vmem>>, vector<8x8xf32>
    tpu.vector_store %arg7[%c0_23, %c16], %74 {strides = array<i32>} : memref<16x32xf32, #tpu.memory_space<vmem>>, vector<8x8xf32>,
    %76 = vector.extract_strided_slice %6 {offsets = [0, 24], sizes = [8, 8], strides = [1, 1]} : vector<16x96xf32> to vector<8x8xf32>
    %77 = arith.truncf %76 : vector<8x8xf32> to vector<8x8xbf16>
    %78 = vector.extract_strided_slice %6 {offsets = [0, 56], sizes = [8, 8], strides = [1, 1]} : vector<16x96xf32> to vector<8x8xf32>
    %79 = arith.truncf %78 : vector<8x8xf32> to vector<8x8xbf16>
    %80 = vector.extract_strided_slice %6 {offsets = [0, 88], sizes = [8, 8], strides = [1, 1]} : vector<16x96xf32> to vector<8x8xf32>
    %81 = arith.truncf %80 : vector<8x8xf32> to vector<8x8xbf16>
    %cst_24 = arith.constant dense<0.000000e+00> : vector<8x8xf32>
    %82 = tpu.matmul %77, %79, %cst_24 {dimension_numbers = #tpu.dot_dimension_numbers<[1], [1], [0], [0], [0, 0, 1, 0], [], []>} : vector<8x8xbf16>, vector<8x8xbf16>, vector<8x8xf32> -> vector<8x8xf32>
    %cst_25 = arith.constant -1.000000e+30 : f32
    %83 = vector.broadcast %cst_25 : f32 to vector<8x8xf32>
    %84 = arith.select %9, %83, %82 : vector<8x8xi1>, vector<8x8xf32>
    %cst_26 = arith.constant dense<0xFF800000> : vector<8xf32>
    %85 = vector.multi_reduction <maximumf>, %84, %cst_26 [1] : vector<8x8xf32> to vector<8xf32>
    %86 = vector.shape_cast %85 : vector<8xf32> to vector<8x1xf32>
    %87 = vector.broadcast %86 : vector<8x1xf32> to vector<8x8xf32>
    %88 = arith.subf %84, %87 : vector<8x8xf32>
    %89 = math.exp %88 : vector<8x8xf32>
    %cst_27 = arith.constant dense<0.000000e+00> : vector<8xf32>
    %90 = vector.multi_reduction <add>, %89, %cst_27 [1] : vector<8x8xf32> to vector<8xf32>
    %91 = vector.shape_cast %90 : vector<8xf32> to vector<8x1xf32>
    %92 = tpu.reciprocal %91 {approx = true} : vector<8x1xf32> -> vector<8x1xf32>
    %93 = vector.broadcast %92 : vector<8x1xf32> to vector<8x8xf32>
    %94 = arith.mulf %89, %93 : vector<8x8xf32>
    %95 = arith.truncf %94 : vector<8x8xf32> to vector<8x8xbf16>
    %cst_28 = arith.constant dense<0.000000e+00> : vector<8x8xf32>
    %96 = tpu.matmul %95, %81, %cst_28 {dimension_numbers = #tpu.dot_dimension_numbers<[1], [0], [0], [1], [0, 0, 1, 1], [], []>} : vector<8x8xbf16>, vector<8x8xbf16>, vector<8x8xf32> -> vector<8x8xf32>
    %c0_29 = arith.constant 0 : index
    %c24 = arith.constant 24 : index
    %97 = vector.load %arg7[%c0_29, %c24] : memref<16x32xf32, #tpu.memory_space<vmem>>, vector<8x8xf32>
    tpu.vector_store %arg7[%c0_29, %c24], %96 {strides = array<i32>} : memref<16x32xf32, #tpu.memory_space<vmem>>, vector<8x8xf32>,
    %98 = vector.extract_strided_slice %6 {offsets = [8, 0], sizes = [8, 8], strides = [1, 1]} : vector<16x96xf32> to vector<8x8xf32>
    %99 = arith.truncf %98 : vector<8x8xf32> to vector<8x8xbf16>
    %100 = vector.extract_strided_slice %6 {offsets = [8, 32], sizes = [8, 8], strides = [1, 1]} : vector<16x96xf32> to vector<8x8xf32>
    %101 = arith.truncf %100 : vector<8x8xf32> to vector<8x8xbf16>
    %102 = vector.extract_strided_slice %6 {offsets = [8, 64], sizes = [8, 8], strides = [1, 1]} : vector<16x96xf32> to vector<8x8xf32>
    %103 = arith.truncf %102 : vector<8x8xf32> to vector<8x8xbf16>
    %cst_30 = arith.constant dense<0.000000e+00> : vector<8x8xf32>
    %104 = tpu.matmul %99, %101, %cst_30 {dimension_numbers = #tpu.dot_dimension_numbers<[1], [1], [0], [0], [0, 0, 1, 0], [], []>} : vector<8x8xbf16>, vector<8x8xbf16>, vector<8x8xf32> -> vector<8x8xf32>
    %cst_31 = arith.constant -1.000000e+30 : f32
    %105 = vector.broadcast %cst_31 : f32 to vector<8x8xf32>
    %106 = arith.select %9, %105, %104 : vector<8x8xi1>, vector<8x8xf32>
    %cst_32 = arith.constant dense<0xFF800000> : vector<8xf32>
    %107 = vector.multi_reduction <maximumf>, %106, %cst_32 [1] : vector<8x8xf32> to vector<8xf32>
    %108 = vector.shape_cast %107 : vector<8xf32> to vector<8x1xf32>
    %109 = vector.broadcast %108 : vector<8x1xf32> to vector<8x8xf32>
    %110 = arith.subf %106, %109 : vector<8x8xf32>
    %111 = math.exp %110 : vector<8x8xf32>
    %cst_33 = arith.constant dense<0.000000e+00> : vector<8xf32>
    %112 = vector.multi_reduction <add>, %111, %cst_33 [1] : vector<8x8xf32> to vector<8xf32>
    %113 = vector.shape_cast %112 : vector<8xf32> to vector<8x1xf32>
    %114 = tpu.reciprocal %113 {approx = true} : vector<8x1xf32> -> vector<8x1xf32>
    %115 = vector.broadcast %114 : vector<8x1xf32> to vector<8x8xf32>
    %116 = arith.mulf %111, %115 : vector<8x8xf32>
    %117 = arith.truncf %116 : vector<8x8xf32> to vector<8x8xbf16>
    %cst_34 = arith.constant dense<0.000000e+00> : vector<8x8xf32>
    %118 = tpu.matmul %117, %103, %cst_34 {dimension_numbers = #tpu.dot_dimension_numbers<[1], [0], [0], [1], [0, 0, 1, 1], [], []>} : vector<8x8xbf16>, vector<8x8xbf16>, vector<8x8xf32> -> vector<8x8xf32>
    %c8_35 = arith.constant 8 : index
    %c0_36 = arith.constant 0 : index
    %119 = vector.load %arg7[%c8_35, %c0_36] : memref<16x32xf32, #tpu.memory_space<vmem>>, vector<8x8xf32>
    tpu.vector_store %arg7[%c8_35, %c0_36], %118 {strides = array<i32>} : memref<16x32xf32, #tpu.memory_space<vmem>>, vector<8x8xf32>,
    %120 = vector.extract_strided_slice %6 {offsets = [8, 8], sizes = [8, 8], strides = [1, 1]} : vector<16x96xf32> to vector<8x8xf32>
    %121 = arith.truncf %120 : vector<8x8xf32> to vector<8x8xbf16>
    %122 = vector.extract_strided_slice %6 {offsets = [8, 40], sizes = [8, 8], strides = [1, 1]} : vector<16x96xf32> to vector<8x8xf32>
    %123 = arith.truncf %122 : vector<8x8xf32> to vector<8x8xbf16>
    %124 = vector.extract_strided_slice %6 {offsets = [8, 72], sizes = [8, 8], strides = [1, 1]} : vector<16x96xf32> to vector<8x8xf32>
    %125 = arith.truncf %124 : vector<8x8xf32> to vector<8x8xbf16>
    %cst_37 = arith.constant dense<0.000000e+00> : vector<8x8xf32>
    %126 = tpu.matmul %121, %123, %cst_37 {dimension_numbers = #tpu.dot_dimension_numbers<[1], [1], [0], [0], [0, 0, 1, 0], [], []>} : vector<8x8xbf16>, vector<8x8xbf16>, vector<8x8xf32> -> vector<8x8xf32>
    %cst_38 = arith.constant -1.000000e+30 : f32
    %127 = vector.broadcast %cst_38 : f32 to vector<8x8xf32>
    %128 = arith.select %9, %127, %126 : vector<8x8xi1>, vector<8x8xf32>
    %cst_39 = arith.constant dense<0xFF800000> : vector<8xf32>
    %129 = vector.multi_reduction <maximumf>, %128, %cst_39 [1] : vector<8x8xf32> to vector<8xf32>
    %130 = vector.shape_cast %129 : vector<8xf32> to vector<8x1xf32>
    %131 = vector.broadcast %130 : vector<8x1xf32> to vector<8x8xf32>
    %132 = arith.subf %128, %131 : vector<8x8xf32>
    %133 = math.exp %132 : vector<8x8xf32>
    %cst_40 = arith.constant dense<0.000000e+00> : vector<8xf32>
    %134 = vector.multi_reduction <add>, %133, %cst_40 [1] : vector<8x8xf32> to vector<8xf32>
    %135 = vector.shape_cast %134 : vector<8xf32> to vector<8x1xf32>
    %136 = tpu.reciprocal %135 {approx = true} : vector<8x1xf32> -> vector<8x1xf32>
    %137 = vector.broadcast %136 : vector<8x1xf32> to vector<8x8xf32>
    %138 = arith.mulf %133, %137 : vector<8x8xf32>
    %139 = arith.truncf %138 : vector<8x8xf32> to vector<8x8xbf16>
    %cst_41 = arith.constant dense<0.000000e+00> : vector<8x8xf32>
    %140 = tpu.matmul %139, %125, %cst_41 {dimension_numbers = #tpu.dot_dimension_numbers<[1], [0], [0], [1], [0, 0, 1, 1], [], []>} : vector<8x8xbf16>, vector<8x8xbf16>, vector<8x8xf32> -> vector<8x8xf32>
    %c8_42 = arith.constant 8 : index
    %c8_43 = arith.constant 8 : index
    %141 = vector.load %arg7[%c8_42, %c8_43] : memref<16x32xf32, #tpu.memory_space<vmem>>, vector<8x8xf32>
    tpu.vector_store %arg7[%c8_42, %c8_43], %140 {strides = array<i32>} : memref<16x32xf32, #tpu.memory_space<vmem>>, vector<8x8xf32>,
    %142 = vector.extract_strided_slice %6 {offsets = [8, 16], sizes = [8, 8], strides = [1, 1]} : vector<16x96xf32> to vector<8x8xf32>
    %143 = arith.truncf %142 : vector<8x8xf32> to vector<8x8xbf16>
    %144 = vector.extract_strided_slice %6 {offsets = [8, 48], sizes = [8, 8], strides = [1, 1]} : vector<16x96xf32> to vector<8x8xf32>
    %145 = arith.truncf %144 : vector<8x8xf32> to vector<8x8xbf16>
    %146 = vector.extract_strided_slice %6 {offsets = [8, 80], sizes = [8, 8], strides = [1, 1]} : vector<16x96xf32> to vector<8x8xf32>
    %147 = arith.truncf %146 : vector<8x8xf32> to vector<8x8xbf16>
    %cst_44 = arith.constant dense<0.000000e+00> : vector<8x8xf32>
    %148 = tpu.matmul %143, %145, %cst_44 {dimension_numbers = #tpu.dot_dimension_numbers<[1], [1], [0], [0], [0, 0, 1, 0], [], []>} : vector<8x8xbf16>, vector<8x8xbf16>, vector<8x8xf32> -> vector<8x8xf32>
    %cst_45 = arith.constant -1.000000e+30 : f32
    %149 = vector.broadcast %cst_45 : f32 to vector<8x8xf32>
    %150 = arith.select %9, %149, %148 : vector<8x8xi1>, vector<8x8xf32>
    %cst_46 = arith.constant dense<0xFF800000> : vector<8xf32>
    %151 = vector.multi_reduction <maximumf>, %150, %cst_46 [1] : vector<8x8xf32> to vector<8xf32>
    %152 = vector.shape_cast %151 : vector<8xf32> to vector<8x1xf32>
    %153 = vector.broadcast %152 : vector<8x1xf32> to vector<8x8xf32>
    %154 = arith.subf %150, %153 : vector<8x8xf32>
    %155 = math.exp %154 : vector<8x8xf32>
    %cst_47 = arith.constant dense<0.000000e+00> : vector<8xf32>
    %156 = vector.multi_reduction <add>, %155, %cst_47 [1] : vector<8x8xf32> to vector<8xf32>
    %157 = vector.shape_cast %156 : vector<8xf32> to vector<8x1xf32>
    %158 = tpu.reciprocal %157 {approx = true} : vector<8x1xf32> -> vector<8x1xf32>
    %159 = vector.broadcast %158 : vector<8x1xf32> to vector<8x8xf32>
    %160 = arith.mulf %155, %159 : vector<8x8xf32>
    %161 = arith.truncf %160 : vector<8x8xf32> to vector<8x8xbf16>
    %cst_48 = arith.constant dense<0.000000e+00> : vector<8x8xf32>
    %162 = tpu.matmul %161, %147, %cst_48 {dimension_numbers = #tpu.dot_dimension_numbers<[1], [0], [0], [1], [0, 0, 1, 1], [], []>} : vector<8x8xbf16>, vector<8x8xbf16>, vector<8x8xf32> -> vector<8x8xf32>
    %c8_49 = arith.constant 8 : index
    %c16_50 = arith.constant 16 : index
    %163 = vector.load %arg7[%c8_49, %c16_50] : memref<16x32xf32, #tpu.memory_space<vmem>>, vector<8x8xf32>
    tpu.vector_store %arg7[%c8_49, %c16_50], %162 {strides = array<i32>} : memref<16x32xf32, #tpu.memory_space<vmem>>, vector<8x8xf32>,
    %164 = vector.extract_strided_slice %6 {offsets = [8, 24], sizes = [8, 8], strides = [1, 1]} : vector<16x96xf32> to vector<8x8xf32>
    %165 = arith.truncf %164 : vector<8x8xf32> to vector<8x8xbf16>
    %166 = vector.extract_strided_slice %6 {offsets = [8, 56], sizes = [8, 8], strides = [1, 1]} : vector<16x96xf32> to vector<8x8xf32>
    %167 = arith.truncf %166 : vector<8x8xf32> to vector<8x8xbf16>
    %168 = vector.extract_strided_slice %6 {offsets = [8, 88], sizes = [8, 8], strides = [1, 1]} : vector<16x96xf32> to vector<8x8xf32>
    %169 = arith.truncf %168 : vector<8x8xf32> to vector<8x8xbf16>
    %cst_51 = arith.constant dense<0.000000e+00> : vector<8x8xf32>
    %170 = tpu.matmul %165, %167, %cst_51 {dimension_numbers = #tpu.dot_dimension_numbers<[1], [1], [0], [0], [0, 0, 1, 0], [], []>} : vector<8x8xbf16>, vector<8x8xbf16>, vector<8x8xf32> -> vector<8x8xf32>
    %cst_52 = arith.constant -1.000000e+30 : f32
    %171 = vector.broadcast %cst_52 : f32 to vector<8x8xf32>
    %172 = arith.select %9, %171, %170 : vector<8x8xi1>, vector<8x8xf32>
    %cst_53 = arith.constant dense<0xFF800000> : vector<8xf32>
    %173 = vector.multi_reduction <maximumf>, %172, %cst_53 [1] : vector<8x8xf32> to vector<8xf32>
    %174 = vector.shape_cast %173 : vector<8xf32> to vector<8x1xf32>
    %175 = vector.broadcast %174 : vector<8x1xf32> to vector<8x8xf32>
    %176 = arith.subf %172, %175 : vector<8x8xf32>
    %177 = math.exp %176 : vector<8x8xf32>
    %cst_54 = arith.constant dense<0.000000e+00> : vector<8xf32>
    %178 = vector.multi_reduction <add>, %177, %cst_54 [1] : vector<8x8xf32> to vector<8xf32>
    %179 = vector.shape_cast %178 : vector<8xf32> to vector<8x1xf32>
    %180 = tpu.reciprocal %179 {approx = true} : vector<8x1xf32> -> vector<8x1xf32>
    %181 = vector.broadcast %180 : vector<8x1xf32> to vector<8x8xf32>
    %182 = arith.mulf %177, %181 : vector<8x8xf32>
    %183 = arith.truncf %182 : vector<8x8xf32> to vector<8x8xbf16>
    %cst_55 = arith.constant dense<0.000000e+00> : vector<8x8xf32>
    %184 = tpu.matmul %183, %169, %cst_55 {dimension_numbers = #tpu.dot_dimension_numbers<[1], [0], [0], [1], [0, 0, 1, 1], [], []>} : vector<8x8xbf16>, vector<8x8xbf16>, vector<8x8xf32> -> vector<8x8xf32>
    %c8_56 = arith.constant 8 : index
    %c24_57 = arith.constant 24 : index
    %185 = vector.load %arg7[%c8_56, %c24_57] : memref<16x32xf32, #tpu.memory_space<vmem>>, vector<8x8xf32>
    tpu.vector_store %arg7[%c8_56, %c24_57], %184 {strides = array<i32>} : memref<16x32xf32, #tpu.memory_space<vmem>>, vector<8x8xf32>,
    %c0_58 = arith.constant 0 : index
    %c0_59 = arith.constant 0 : index
    %186 = vector.load %arg7[%c0_58, %c0_59] : memref<16x32xf32, #tpu.memory_space<vmem>>, vector<16x32xf32>
    %187 = arith.truncf %186 : vector<16x32xf32> to vector<16x32xbf16>
    %c0_60 = arith.constant 0 : index
    %c0_61 = arith.constant 0 : index
    %188 = vector.load %arg4[%c0_60, %c0_61] : memref<32x32xbf16, #tpu.memory_space<vmem>>, vector<32x32xbf16>
    %cst_62 = arith.constant dense<0.000000e+00> : vector<16x32xf32>
    %189 = tpu.matmul %187, %188, %cst_62 {dimension_numbers = #tpu.dot_dimension_numbers<[1], [0], [0], [1], [0, 0, 1, 1], [], []>} : vector<16x32xbf16>, vector<32x32xbf16>, vector<16x32xf32> -> vector<16x32xf32>
    %c0_63 = arith.constant 0 : index
    %c0_64 = arith.constant 0 : index
    %190 = vector.load %arg5[%c0_63, %c0_64] : memref<1x32xf32, #tpu.memory_space<vmem>>, vector<1x32xf32>
    %191 = vector.broadcast %190 : vector<1x32xf32> to vector<16x32xf32>
    %192 = arith.addf %189, %191 : vector<16x32xf32>
    %c0_65 = arith.constant 0 : index
    %c0_66 = arith.constant 0 : index
    %193 = vector.load %arg6[%c0_65, %c0_66] : memref<16x32xf32, #tpu.memory_space<vmem>>, vector<16x32xf32>
    tpu.vector_store %arg6[%c0_65, %c0_66], %192 {strides = array<i32>} : memref<16x32xf32, #tpu.memory_space<vmem>>, vector<16x32xf32>,
    return
  }
  func.func @transform_0(%arg0: i32) -> (i32, i32) {
    %c0_i32 = arith.constant 0 : i32
    %c0_i32_0 = arith.constant 0 : i32
    %c0_i32_1 = arith.constant 0 : i32
    return %c0_i32, %c0_i32_0 : i32, i32
  }
  func.func @transform_1(%arg0: i32) -> (i32, i32) {
    %c0_i32 = arith.constant 0 : i32
    %c0_i32_0 = arith.constant 0 : i32
    %c0_i32_1 = arith.constant 0 : i32
    return %c0_i32, %c0_i32_0 : i32, i32
  }
  func.func @transform_2(%arg0: i32) -> (i32, i32) {
    %c0_i32 = arith.constant 0 : i32
    %c0_i32_0 = arith.constant 0 : i32
    %c0_i32_1 = arith.constant 0 : i32
    return %c0_i32, %c0_i32_0 : i32, i32
  }
  func.func @transform_3(%arg0: i32) -> (i32, i32) {
    %c0_i32 = arith.constant 0 : i32
    %c0_i32_0 = arith.constant 0 : i32
    %c0_i32_1 = arith.constant 0 : i32
    return %c0_i32, %c0_i32_0 : i32, i32
  }
  func.func @transform_4(%arg0: i32) -> (i32, i32) {
    %c0_i32 = arith.constant 0 : i32
    %c0_i32_0 = arith.constant 0 : i32
    %c0_i32_1 = arith.constant 0 : i32
    return %c0_i32, %c0_i32_0 : i32, i32
  }
  func.func @transform_5(%arg0: i32) -> (i32, i32) {
    %c0_i32 = arith.constant 0 : i32
    %c0_i32_0 = arith.constant 0 : i32
    %c0_i32_1 = arith.constant 0 : i32
    return %c0_i32, %c0_i32_0 : i32, i32
  }
}

</mosaic_0001>

<bundles_post_ra>
// kernel: tpu_custom_call.1
= control target key start
LH: loop header
LB: loop body
LE: loop exit
PB: predicated region body
PF: predicated region fallthrough
CT: control target
= control target key end

     0   :  { %10 = vsyncpa [#allocation4], 0  ;;  %s1764_s0 = inlined_call_operand.hbm [shape: f32[16,32], index: 0, kind: input, shape index: {}]   ;;  %s1765_s1 = inlined_call_operand.hbm [shape: bf16[32,96], index: 1, kind: input, shape index: {}]   ;;  %s1766_s2 = inlined_call_operand.vmem [shape: f32[1,96], index: 2, kind: input, shape index: {}]   ;;  %s1767_s3 = inlined_call_operand.hbm [shape: bf16[32,32], index: 3, kind: input, shape index: {}]   ;;  %s1768_s4 = inlined_call_operand.vmem [shape: f32[1,32], index: 4, kind: input, shape index: {}]   ;;  %s1769_s5 = inlined_call_operand.hbm [shape: f32[16,32], index: 5, kind: output, shape index: {}]  }
   0x1   :  { %11 = vsyncpa [#allocation7], 0 }
   0x2   :  { %12 = vsyncpa [#allocation5], 0  ;;  %s1472_s18 = smov [#allocation6]  }
   0x3   :  { %s30_s19 = sshll.u32 %s1472_s18, 4  ;;  %s31_s19 = int_to_ptr.vmem [resolvable:$true] %s30_s19 }
   0x4   :  { %s1394_s20 = scalar_lea.vmem %s31_s19, 256  ;;  %p1399_p1 = scmp.lt.s32.totalorder %s31_s19, %s31_s19 }
   0x5   :  { %p1395_p0 = scmp.ne.s32.totalorder %s31_s19, %s1394_s20  ;;  %p1400_p2 = scmp.lt.s32.totalorder %s1394_s20, %s1394_s20 }
   0x7   :  { %p1401_p3 = por %p1400_p2, %p1399_p1 }
   0x9   :  { %p1402_p4 = pnand %p1401_p3, %p1395_p0 }
   0xb   :  { %1405 = shalt.err (!%p1402_p4)
}
   0xc   :  { %s1473_s21 = smov 64   ;;  %s1474_s22 = smov 4  }
   0xd   :  { %36 = dma.hbm_to_vmem [thread:$0]  %s1765_s1, 256, %s31_s19, [#allocation7], %s1473_s21, %s1473_s21, %s1474_s22  }
   0xe   :  { %s1475_s25 = smov [#allocation3]  }
   0xf   :  { %s18_s26 = sshll.u32 %s1475_s25, 4  ;;  %s19_s26 = int_to_ptr.vmem [resolvable:$true] %s18_s26 }
  0x10   :  { %s1414_s27 = scalar_lea.vmem %s19_s26, 256  ;;  %p1419_p6 = scmp.lt.s32.totalorder %s19_s26, %s19_s26 }
  0x11   :  { %p1415_p5 = scmp.ne.s32.totalorder %s19_s26, %s1414_s27  ;;  %p1420_p7 = scmp.lt.s32.totalorder %s1414_s27, %s1414_s27 }
  0x13   :  { %p1421_p8 = por %p1420_p7, %p1419_p6 }
  0x15   :  { %p1422_p9 = pnand %p1421_p8, %p1415_p5 }
  0x17   :  { %1425 = shalt.err (!%p1422_p9)
}
  0x18   :  { %s1476_s28 = smov 128   ;;  %s1477_s29 = smov 8  }
  0x19   :  { %24 = dma.hbm_to_vmem [thread:$0]  %s1764_s0, 256, %s19_s26, [#allocation4], %s1476_s28, %s1476_s28, %s1477_s29  }
  0x1a   :  { %s1478_s1 = smov [#allocation8]  }
  0x1b   :  { %s44_s7 = sshll.u32 %s1478_s1, 4  ;;  %s45_s7 = int_to_ptr.vmem [resolvable:$true] %s44_s7 }
  0x1c   :  { %s1434_s8 = scalar_lea.vmem %s45_s7, 256  ;;  %p1439_p11 = scmp.lt.s32.totalorder %s45_s7, %s45_s7 }
  0x1d   :  { %p1435_p10 = scmp.ne.s32.totalorder %s45_s7, %s1434_s8  ;;  %p1440_p12 = scmp.lt.s32.totalorder %s1434_s8, %s1434_s8 }
  0x1f   :  { %p1441_p13 = por %p1440_p12, %p1439_p11 }
  0x21   :  { %p1442_p0 = pnand %p1441_p13, %p1435_p10 }
  0x23   :  { %1445 = shalt.err (!%p1442_p0)
}
  0x24   :  { %50 = dma.hbm_to_vmem [thread:$0]  %s1767_s3, 256, %s45_s7, [#allocation7], %s1473_s21, %s1473_s21, %s1474_s22  }
  0x25   :  { %1466 = dma.done.wait [#allocation4], 256  }
  0x26   :  { %1467 = vsyncadd [#allocation4], 4294967040 }
  0x27   :  { %1468 = dma.done.wait [#allocation7], 512  }
  0x28   :  { %1469 = vsyncadd [#allocation7], 4294966784  ;;  %v1479_v0 = vmov 0.0   ;;  %vm1480_vm0 = vmmov 0   ;;  %v1350_v1 = vld [vmem:[#allocation6 + $0x8] sm:$0xff]   ;;  %v1351_v2 = vld [vmem:[#allocation6] sm:$0xff]   ;;  %v134_v37 = vlaneseq }
  0x29   :  { %1216 = vmatprep.subr.bf16.mxu0 %v1479_v0  ;;  %1220 = vmatprep.mubr.msk.bf16.mxu0 %vm1480_vm0, %v1479_v0  ;;  %v63_v3 = vld [vmem:[#allocation3] sm:$0xff]  ;;  %v64_v4 = vld [vmem:[#allocation3 + $0x8] sm:$0xff]  ;;  %vm89_vm1 = vcmask 261120   ;;  %v1154_v6 = vld [vmem:[%s1766_s2] ss:$0 sm:$0xff]  ;;  %s1481_s11 = smov 120  }
  0x2a   :  { %1224 = vmatprep.subr.bf16.mxu1 %v1479_v0  ;;  %1226 = vmatprep.mubr.msk.bf16.mxu1 %vm1480_vm0, %v1479_v0  ;;  %v65_v5 = vpack.c.bf16 %v64_v4, %v63_v3  ;;  %s1482_s12 = smov 96   ;;  %s1483_s13 = smov 80   ;;  %vm143_vm2 = vcmask 64512   ;;  %v135_v38 = vshrl.u32 %v134_v37, 7  ;;  %v137_v39 = vand.u32 127, %v134_v37 }
  0x2b   :  { %1217 = vmatpush3.bf16.msra.mxu0 %v1350_v1  ;;  %s1484_s14 = smov 88   ;;  %s1485_s2 = smov 72   ;;  %vm208_vm4 = vcmask 1043456   ;;  %vm368_vm5 = vcmask 130112   ;;  %vm485_vm6 = vcmask 195712   ;;  %vm602_vm7 = vcmask 261312  }
  0x2c   :  { %1218 = vmatprep.subr.bf16.mxu0 %v1479_v0  ;;  %s1486_s15 = smov 112   ;;  %s1487_s16 = smov 104   ;;  %vm1614_vm3 = vcmp.gt.s32.totalorder %v137_v39, %v135_v38 }
  0x2d   :  { %s1488_s17 = smov 56   ;;  %s1489_s18 = smov 48  }
  0x2e   :  { %s1490_s19 = smov 40   ;;  %s1491_s20 = smov 16  }
  0x2f   :  { %1219 = vmatpush3.bf16.msra.mxu0 %v1351_v2  ;;  %s1493_s24 = smov [#allocation9]  }
  0x30   :  { %1230 = vmatprep.subr.bf16.mxu0 %v1479_v0  ;;  %s1141_s25 = sshll.u32 %s1493_s24, 4  ;;  %s1142_s25 = int_to_ptr.vmem [resolvable:$true] %s1141_s25 }
  0x31   :  { %s1446_s26 = scalar_lea.vmem %s1142_s25, 256  ;;  %p1451_p2 = scmp.lt.s32.totalorder %s1142_s25, %s1142_s25 }
  0x32   :  { %1221 = vmatmul.mubr.msk.bf16.vlgmr.msra.gmra.mxu0 %vm89_vm1, %v65_v5  ;;  %p1447_p1 = scmp.ne.s32.totalorder %s1142_s25, %s1446_s26  ;;  %p1452_p3 = scmp.lt.s32.totalorder %s1446_s26, %s1446_s26 }
  0x33   :  { %1232 = vmatprep.mubr.msk.bf16.mxu0 %vm1480_vm0, %v1479_v0 }
  0x34   :  { %p1453_p4 = por %p1452_p3, %p1451_p2 }
  0x36   :  { %p1454_p5 = pnand %p1453_p4, %p1447_p1 }
  0xf2   :  { %v127_v7 = vpop.f32.mrf.mxu0 }
  0xf3   :  { %v128_v8 = vadd.f32 %v1154_v6, %v127_v7 }
  0xf4   :  { %v1222_v9 = vpop.f32.mrf.mxu0 }
  0xf5   :  { %v1554_v10 = vpack.c.bf16 %v128_v8, %v128_v8 }
  0xf6   :  { %v130_v11 = vpop.f32.mrf.mxu0 }
  0xf7   :  { %253 = vrot.lane.b32.xlu1 %v1554_v10, %s1481_s11  ;;  %141 = vrot.lane.b32.xlu0 %v1554_v10, %s1482_s12  ;;  %v131_v13 = vadd.f32 %v1154_v6, %v130_v11 }
  0xf8   :  { %v1223_v12 = vpop.f32.mrf.mxu0 }
  0xf9   :  { %v1562_v14 = vpack.c.bf16 %v131_v13, %v131_v13 }
  0xfb   :  { %372 = vrot.lane.b32.xlu1 %v1554_v10, %s1483_s13  ;;  %255 = vrot.lane.b32.xlu0 %v1554_v10, %s1484_s14 }
  0xff   :  { %489 = vrot.lane.b32.xlu1 %v1554_v10, %s1485_s2  ;;  %370 = vrot.lane.b32.xlu0 %v1554_v10, %s1486_s15 }
 0x103   :  { %487 = vrot.lane.b32.xlu0 %v1554_v10, %s1487_s16  ;;  %606 = vrot.lane.b32.xlu1 %v1562_v14, %s1482_s12 }
 0x107   :  { %718 = vrot.lane.b32.xlu0 %v1562_v14, %s1484_s14  ;;  %716 = vrot.lane.b32.xlu1 %v1562_v14, %s1481_s11 }
 0x10b   :  { %834 = vrot.lane.b32.xlu0 %v1562_v14, %s1483_s13  ;;  %832 = vrot.lane.b32.xlu1 %v1562_v14, %s1486_s15 }
 0x10f   :  { %950 = vrot.lane.b32.xlu0 %v1562_v14, %s1485_s2  ;;  %948 = vrot.lane.b32.xlu1 %v1562_v14, %s1487_s16 }
 0x169   :  { %v142_v15 = vpop.permute.xlu0 %141  ;;  %v254_v18 = vpop.permute.xlu1 %253 }
 0x16a   :  { %v148_v16 = vsel %vm143_vm2, %v142_v15, 0 }
 0x16b   :  { %1225 = vmatpush3.bf16.xpose.msra.mxu1 %v148_v16 }
 0x16c   :  { %1236 = vmatprep.subr.bf16.mxu1 %v1479_v0 }
 0x16d   :  { %v256_v17 = vpop.permute.xlu0 %255  ;;  %v373_v20 = vpop.permute.xlu1 %372 }
 0x16e   :  { %v261_v19 = vsel %vm143_vm2, %v256_v17, 0  ;;  %v378_v21 = vsel %vm143_vm2, %v373_v20, 0 }
 0x171   :  { %v490_v22 = vpop.permute.xlu1 %489  ;;  %v371_v23 = vpop.permute.xlu0 %370 }
 0x172   :  { %1227 = vmatmul.mubr.msk.bf16.vlgmr.msra.gmra.mxu1 %vm143_vm2, %v1554_v10  ;;  %v495_v24 = vsel %vm143_vm2, %v490_v22, 0 }
 0x173   :  { %1237 = vmatpush3.bf16.xpose.msra.mxu1 %v261_v19  ;;  %1238 = vmatprep.mubr.msk.bf16.mxu1 %vm1480_vm0, %v1479_v0 }
 0x174   :  { %1248 = vmatprep.subr.bf16.mxu1 %v1479_v0 }
 0x175   :  { %v607_v25 = vpop.permute.xlu1 %606  ;;  %v488_v26 = vpop.permute.xlu0 %487 }
 0x176   :  { %v612_v27 = vsel %vm143_vm2, %v607_v25, 0 }
 0x179   :  { %v719_v28 = vpop.permute.xlu0 %718  ;;  %v717_v31 = vpop.permute.xlu1 %716 }
 0x17a   :  { %1239 = vmatmul.mubr.msk.bf16.vlgmr.msra.gmra.mxu1 %vm143_vm2, %v254_v18  ;;  %v724_v29 = vsel %vm143_vm2, %v719_v28, 0 }
 0x17b   :  { %1249 = vmatpush3.bf16.xpose.msra.mxu1 %v378_v21  ;;  %1250 = vmatprep.mubr.msk.bf16.mxu1 %vm1480_vm0, %v1479_v0 }
 0x17c   :  { %1260 = vmatprep.subr.bf16.mxu1 %v1479_v0 }
 0x17d   :  { %v835_v30 = vpop.permute.xlu0 %834  ;;  %v833_v34 = vpop.permute.xlu1 %832 }
 0x17e   :  { %v840_v32 = vsel %vm143_vm2, %v835_v30, 0 }
 0x181   :  { %v951_v33 = vpop.permute.xlu0 %950  ;;  %v949_v36 = vpop.permute.xlu1 %948 }
 0x182   :  { %1251 = vmatmul.mubr.msk.bf16.vlgmr.msra.gmra.mxu1 %vm143_vm2, %v371_v23  ;;  %v956_v35 = vsel %vm143_vm2, %v951_v33, 0 }
 0x183   :  { %1261 = vmatpush3.bf16.xpose.msra.mxu1 %v495_v24  ;;  %1262 = vmatprep.mubr.msk.bf16.mxu1 %vm1480_vm0, %v1479_v0 }
 0x184   :  { %1272 = vmatprep.subr.bf16.mxu1 %v1479_v0 }
 0x18a   :  { %1263 = vmatmul.mubr.msk.bf16.vlgmr.msra.gmra.mxu1 %vm143_vm2, %v488_v26 }
 0x18b   :  { %1273 = vmatpush3.bf16.xpose.msra.mxu1 %v612_v27  ;;  %1274 = vmatprep.mubr.msk.bf16.mxu1 %vm1480_vm0, %v1479_v0 }
 0x18c   :  { %1284 = vmatprep.subr.bf16.mxu1 %v1479_v0 }
 0x192   :  { %1275 = vmatmul.mubr.msk.bf16.vlgmr.msra.gmra.mxu1 %vm143_vm2, %v1562_v14 }
 0x193   :  { %1285 = vmatpush3.bf16.xpose.msra.mxu1 %v724_v29  ;;  %1286 = vmatprep.mubr.msk.bf16.mxu1 %vm1480_vm0, %v1479_v0 }
 0x194   :  { %1296 = vmatprep.subr.bf16.mxu1 %v1479_v0 }
 0x19a   :  { %1287 = vmatmul.mubr.msk.bf16.vlgmr.msra.gmra.mxu1 %vm143_vm2, %v717_v31 }
 0x19b   :  { %1297 = vmatpush3.bf16.xpose.msra.mxu1 %v840_v32  ;;  %1298 = vmatprep.mubr.msk.bf16.mxu1 %vm1480_vm0, %v1479_v0 }
 0x19c   :  { %1308 = vmatprep.subr.bf16.mxu1 %v1479_v0 }
 0x1a2   :  { %1299 = vmatmul.mubr.msk.bf16.vlgmr.msra.gmra.mxu1 %vm143_vm2, %v833_v34 }
 0x1a3   :  { %1309 = vmatpush3.bf16.xpose.msra.mxu1 %v956_v35  ;;  %1310 = vmatprep.mubr.msk.bf16.mxu1 %vm1480_vm0, %v1479_v0 }
 0x1a4   :  { %1320 = vmatprep.subr.bf16.mxu1 %v1479_v0 }
 0x1aa   :  { %1311 = vmatmul.mubr.msk.bf16.vlgmr.msra.gmra.mxu1 %vm143_vm2, %v949_v36 }
 0x1ab   :  { %1324 = vmatprep.mubr.msk.bf16.mxu1 %vm1480_vm0, %v1479_v0 }
 0x232   :  { %v184_v41 = vpop.f32.mrf.mxu1 }
 0x233   :  { %v190_v42 = vsel %vm1614_vm3, -1e+30, %v184_v41 }
 0x234   :  { %v1228_v43 = vpop.f32.mrf.mxu1  ;;  %v191_v44 = vsel %vm143_vm2, %v190_v42, -inf }
 0x235   :  { %192 = vmax.xlane.f32.xlu0 %v191_v44 }
 0x236   :  { %v187_v45 = vpop.f32.mrf.mxu1 }
 0x238   :  { %v1229_v46 = vpop.f32.mrf.mxu1 }
 0x23a   :  { %v297_v47 = vpop.f32.mrf.mxu1 }
 0x23b   :  { %v303_v48 = vsel %vm1614_vm3, -1e+30, %v297_v47 }
 0x23c   :  { %v1240_v49 = vpop.f32.mrf.mxu1  ;;  %v304_v50 = vsel %vm143_vm2, %v303_v48, -inf }
 0x23d   :  { %305 = vmax.xlane.f32.xlu1 %v304_v50 }
 0x23e   :  { %v300_v51 = vpop.f32.mrf.mxu1 }
 0x240   :  { %v1241_v52 = vpop.f32.mrf.mxu1 }
 0x242   :  { %v414_v53 = vpop.f32.mrf.mxu1 }
 0x243   :  { %v420_v54 = vsel %vm1614_vm3, -1e+30, %v414_v53 }
 0x244   :  { %v1252_v55 = vpop.f32.mrf.mxu1  ;;  %v421_v56 = vsel %vm143_vm2, %v420_v54, -inf }
 0x245   :  { %422 = vmax.xlane.f32.xlu0 %v421_v56 }
 0x246   :  { %v417_v57 = vpop.f32.mrf.mxu1 }
 0x248   :  { %v1253_v58 = vpop.f32.mrf.mxu1 }
 0x24a   :  { %v531_v59 = vpop.f32.mrf.mxu1 }
 0x24b   :  { %v1629_v60 = vsel %vm1614_vm3, -1e+30, %v531_v59 }
 0x24c   :  { %v1264_v61 = vpop.f32.mrf.mxu1  ;;  %v538_v62 = vsel %vm143_vm2, %v1629_v60, -inf }
 0x24d   :  { %539 = vmax.xlane.f32.xlu0 %v538_v62 }
 0x24e   :  { %v534_v63 = vpop.f32.mrf.mxu1 }
 0x250   :  { %v1265_v1 = vpop.f32.mrf.mxu1 }
 0x252   :  { %v648_v2 = vpop.f32.mrf.mxu1 }
 0x253   :  { %v1635_v3 = vsel %vm1614_vm3, -1e+30, %v648_v2 }
 0x254   :  { %v1276_v4 = vpop.f32.mrf.mxu1  ;;  %v655_v5 = vsel %vm143_vm2, %v1635_v3, -inf }
 0x255   :  { %656 = vmax.xlane.f32.xlu1 %v655_v5 }
 0x256   :  { %v651_v6 = vpop.f32.mrf.mxu1 }
 0x258   :  { %v1277_v7 = vpop.f32.mrf.mxu1 }
 0x25a   :  { %v760_v8 = vpop.f32.mrf.mxu1 }
 0x25b   :  { %v1641_v9 = vsel %vm1614_vm3, -1e+30, %v760_v8 }
 0x25c   :  { %v1288_v11 = vpop.f32.mrf.mxu1  ;;  %v767_v12 = vsel %vm143_vm2, %v1641_v9, -inf }
 0x25d   :  { %768 = vmax.xlane.f32.xlu0 %v767_v12 }
 0x25e   :  { %v763_v13 = vpop.f32.mrf.mxu1 }
 0x260   :  { %v1289_v15 = vpop.f32.mrf.mxu1 }
 0x262   :  { %v876_v16 = vpop.f32.mrf.mxu1 }
 0x263   :  { %v882_v17 = vsel %vm1614_vm3, -1e+30, %v876_v16 }
 0x264   :  { %v1300_v18 = vpop.f32.mrf.mxu1  ;;  %v883_v19 = vsel %vm143_vm2, %v882_v17, -inf }
 0x265   :  { %884 = vmax.xlane.f32.xlu1 %v883_v19 }
 0x266   :  { %v879_v20 = vpop.f32.mrf.mxu1 }
 0x268   :  { %v1301_v21 = vpop.f32.mrf.mxu1 }
 0x26a   :  { %v992_v22 = vpop.f32.mrf.mxu1 }
 0x26b   :  { %v1654_v26 = vsel %vm1614_vm3, -1e+30, %v992_v22 }
 0x26c   :  { %v1312_v23 = vpop.f32.mrf.mxu1  ;;  %v999_v27 = vsel %vm143_vm2, %v1654_v26, -inf }
 0x26e   :  { %v995_v24 = vpop.f32.mrf.mxu1 }
 0x270   :  { %v1313_v25 = vpop.f32.mrf.mxu1 }
 0x273   :  { %316 = vrot.lane.b32.xlu0 %v1554_v10, %s1488_s17 }
 0x276   :  { %203 = vrot.lane.b32.xlu1 %v1554_v10, %s1473_s21 }
 0x292   :  { %1000 = vmax.xlane.f32.xlu0 %v999_v27 }
 0x2be   :  { %v193_v28 = vpop.xlane.xlu0 %192 }
 0x2bf   :  { %v194_v29 = vsub.f32 %v190_v42, %v193_v28 }
 0x2c1   :  { %v195_v30 = vmul.f32 1.442695, %v194_v29 }
 0x2c3   :  { %1354 = vpow2.f32 %v195_v30 }
 0x2c6   :  { %v306_v31 = vpop.xlane.xlu1 %305 }
 0x2c7   :  { %v307_v32 = vsub.f32 %v303_v48, %v306_v31 }
 0x2c9   :  { %v308_v33 = vmul.f32 1.442695, %v307_v32 }
 0x2cb   :  { %1356 = vpow2.f32 %v308_v33 }
 0x2ce   :  { %v423_v34 = vpop.xlane.xlu0 %422 }
 0x2cf   :  { %v424_v35 = vsub.f32 %v420_v54, %v423_v34 }
 0x2d0   :  { %v1658_v36 = vpop.eup %1354 }
 0x2d1   :  { %v425_v37 = vmul.f32 1.442695, %v424_v35  ;;  %v197_v38 = vsel %vm143_vm2, %v1658_v36, 0.0 }
 0x2d2   :  { %198 = vadd.xlane.f32.xlu1 %v197_v38 }
 0x2d3   :  { %1358 = vpow2.f32 %v425_v37 }
 0x2d6   :  { %v540_v46 = vpop.xlane.xlu0 %539 }
 0x2d7   :  { %v541_v48 = vsub.f32 %v1629_v60, %v540_v46 }
 0x2d8   :  { %v1662_v39 = vpop.eup %1356 }
 0x2d9   :  { %v310_v40 = vsel %vm143_vm2, %v1662_v39, 0.0  ;;  %v542_v49 = vmul.f32 1.442695, %v541_v48 }
 0x2da   :  { %311 = vadd.xlane.f32.xlu0 %v310_v40 }
 0x2db   :  { %1360 = vpow2.f32 %v542_v49 }
 0x2de   :  { %v657_v43 = vpop.xlane.xlu1 %656 }
 0x2df   :  { %v658_v50 = vsub.f32 %v1635_v3, %v657_v43 }
 0x2e0   :  { %v1666_v41 = vpop.eup %1358 }
 0x2e1   :  { %v427_v42 = vsel %vm143_vm2, %v1666_v41, 0.0  ;;  %v659_v53 = vmul.f32 1.442695, %v658_v50 }
 0x2e2   :  { %428 = vadd.xlane.f32.xlu1 %v427_v42 }
 0x2e3   :  { %1362 = vpow2.f32 %v659_v53 }
 0x2e6   :  { %v769_v51 = vpop.xlane.xlu0 %768 }
 0x2e7   :  { %v770_v52 = vsub.f32 %v1641_v9, %v769_v51 }
 0x2e9   :  { %v771_v55 = vmul.f32 1.442695, %v770_v52 }
 0x2ea   :  { %v317_v1 = vpop.permute.xlu0 %316 }
 0x2eb   :  { %1364 = vpow2.f32 %v771_v55  ;;  %v322_v15 = vsel %vm208_vm4, %v317_v1, 0 }
 0x2ee   :  { %v885_v44 = vpop.xlane.xlu1 %884 }
 0x2ef   :  { %v886_v54 = vsub.f32 %v882_v17, %v885_v44 }
 0x2f0   :  { %433 = vrot.lane.b32.xlu0 %v1554_v10, %s1489_s18 }
 0x2f1   :  { %v887_v56 = vmul.f32 1.442695, %v886_v54 }
 0x2f2   :  { %v204_v45 = vpop.permute.xlu1 %203 }
 0x2f3   :  { %v210_v47 = vsel %vm208_vm4, %v204_v45, 0  ;;  %550 = vrot.lane.b32.xlu1 %v1554_v10, %s1490_s19  ;;  %1366 = vpow2.f32 %v887_v56  ;;  %v1361_v10 = vpop.eup %1360 }
 0x2f4   :  { %1231 = vmatpush3.bf16.msra.mxu0 %v210_v47  ;;  %v544_v57 = vsel %vm143_vm2, %v1361_v10, 0.0  ;;  %v1680_v58 = vpop.eup %1362 }
 0x2f5   :  { %1242 = vmatprep.subr.bf16.mxu0 %v1479_v0  ;;  %v661_v60 = vsel %vm143_vm2, %v1680_v58, 0.0 }
 0x2f8   :  { %v1682_v59 = vpop.eup %1364 }
 0x2f9   :  { %v773_v62 = vsel %vm143_vm2, %v1682_v59, 0.0 }
 0x300   :  { %v1686_v61 = vpop.eup %1366 }
 0x301   :  { %v889_v63 = vsel %vm143_vm2, %v1686_v61, 0.0 }
 0x30f   :  { %545 = vadd.xlane.f32.xlu0 %v544_v57 }
 0x313   :  { %662 = vadd.xlane.f32.xlu0 %v661_v60 }
 0x317   :  { %774 = vadd.xlane.f32.xlu1 %v773_v62  ;;  %890 = vadd.xlane.f32.xlu0 %v889_v63 }
 0x31b   :  { %v1001_v2 = vpop.xlane.xlu0 %1000 }
 0x31c   :  { %v1002_v3 = vsub.f32 %v1654_v26, %v1001_v2 }
 0x31e   :  { %v1003_v4 = vmul.f32 1.442695, %v1002_v3 }
 0x320   :  { %1368 = vpow2.f32 %v1003_v4 }
 0x328   :  { %779 = vrot.lane.b32.xlu1 %v1562_v14, %s1488_s17 }
 0x32c   :  { %895 = vrot.lane.b32.xlu1 %v1562_v14, %s1489_s18 }
 0x32d   :  { %v1697_v5 = vpop.eup %1368 }
 0x32e   :  { %v1005_v6 = vsel %vm143_vm2, %v1697_v5, 0.0 }
 0x32f   :  { %1006 = vadd.xlane.f32.xlu0 %v1005_v6 }
 0x330   :  { %1011 = vrot.lane.b32.xlu1 %v1562_v14, %s1490_s19 }
 0x345   :  { %667 = vrot.lane.b32.xlu0 %v1562_v14, %s1473_s21  ;;  %s1492_s21 = smov 24  }
 0x35b   :  { %v199_v7 = vpop.xlane.xlu1 %198 }
 0x35c   :  { %1370 = vrcp.f32 %v199_v7 }
 0x363   :  { %v312_v8 = vpop.xlane.xlu0 %311 }
 0x364   :  { %1372 = vrcp.f32 %v312_v8 }
 0x367   :  { %v434_v17 = vpop.permute.xlu0 %433 }
 0x368   :  { %v439_v19 = vsel %vm208_vm4, %v434_v17, 0 }
 0x369   :  { %v1371_v9 = vpop.eup %1370 }
 0x36a   :  { %v201_v11 = vmul.f32 %v1371_v9, %v1658_v36 }
 0x36b   :  { %v429_v12 = vpop.xlane.xlu1 %428 }
 0x36c   :  { %1374 = vrcp.f32 %v429_v12  ;;  %v202_v13 = vpack.c.bf16 %v201_v11, %v201_v11 }
 0x36e   :  { %1233 = vmatmul.mubr.msk.bf16.vlgmr.msra.gmra.mxu0 %vm143_vm2, %v202_v13  ;;  %v1352_v13 = vld [vmem:[#allocation8 + $0x8] sm:$0xff]  }
 0x36f   :  { %1243 = vmatpush3.bf16.msra.mxu0 %v322_v15  ;;  %1244 = vmatprep.mubr.msk.bf16.mxu0 %vm1480_vm0, %v1479_v0  ;;  %v551_v22 = vpop.permute.xlu1 %550 }
 0x370   :  { %1254 = vmatprep.subr.bf16.mxu0 %v1479_v0  ;;  %v556_v24 = vsel %vm208_vm4, %v551_v22, 0  ;;  %1321 = vmatpush3.bf16.msra.mxu1 %v1352_v13 }
 0x371   :  { %v1373_v14 = vpop.eup %1372  ;;  %1322 = vmatprep.subr.bf16.mxu1 %v1479_v0 }
 0x372   :  { %v314_v16 = vmul.f32 %v1373_v14, %v1662_v39  ;;  %v1353_v14 = vld [vmem:[#allocation8] sm:$0xff]  }
 0x374   :  { %v315_v18 = vpack.c.bf16 %v314_v16, %v314_v16  ;;  %1323 = vmatpush3.bf16.msra.mxu1 %v1353_v14 }
 0x376   :  { %1245 = vmatmul.mubr.msk.bf16.vlgmr.msra.gmra.mxu0 %vm143_vm2, %v315_v18 }
 0x377   :  { %1255 = vmatpush3.bf16.msra.mxu0 %v439_v19  ;;  %1256 = vmatprep.mubr.msk.bf16.mxu0 %vm1480_vm0, %v1479_v0 }
 0x378   :  { %1266 = vmatprep.subr.bf16.mxu0 %v1479_v0 }
 0x379   :  { %v1375_v20 = vpop.eup %1374 }
 0x37a   :  { %v431_v21 = vmul.f32 %v1375_v20, %v1666_v41 }
 0x37c   :  { %v432_v23 = vpack.c.bf16 %v431_v21, %v431_v21 }
 0x37e   :  { %1257 = vmatmul.mubr.msk.bf16.vlgmr.msra.gmra.mxu0 %vm143_vm2, %v432_v23 }
 0x37f   :  { %1267 = vmatpush3.bf16.msra.mxu0 %v556_v24  ;;  %1268 = vmatprep.mubr.msk.bf16.mxu0 %vm1480_vm0, %v1479_v0 }
 0x380   :  { %1278 = vmatprep.subr.bf16.mxu0 %v1479_v0 }
 0x398   :  { %v546_v25 = vpop.xlane.xlu0 %545 }
 0x399   :  { %1376 = vrcp.f32 %v546_v25 }
 0x39c   :  { %v663_v28 = vpop.xlane.xlu0 %662 }
 0x39d   :  { %1378 = vrcp.f32 %v663_v28 }
 0x3a0   :  { %v775_v30 = vpop.xlane.xlu1 %774  ;;  %v891_v31 = vpop.xlane.xlu0 %890 }
 0x3a1   :  { %1380 = vrcp.f32 %v775_v30 }
 0x3a2   :  { %1382 = vrcp.f32 %v891_v31 }
 0x3a4   :  { %v780_v37 = vpop.permute.xlu1 %779 }
 0x3a5   :  { %v785_v40 = vsel %vm208_vm4, %v780_v37, 0 }
 0x3a6   :  { %v1377_v26 = vpop.eup %1376 }
 0x3a7   :  { %v548_v27 = vmul.f32 %v1377_v26, %v1361_v10 }
 0x3a8   :  { %v896_v42 = vpop.permute.xlu1 %895 }
 0x3a9   :  { %v549_v29 = vpack.c.bf16 %v548_v27, %v548_v27  ;;  %v901_v45 = vsel %vm208_vm4, %v896_v42, 0 }
 0x3aa   :  { %v1379_v32 = vpop.eup %1378 }
 0x3ab   :  { %1269 = vmatmul.mubr.msk.bf16.vlgmr.msra.gmra.mxu0 %vm143_vm2, %v549_v29  ;;  %v665_v34 = vmul.f32 %v1379_v32, %v1680_v58  ;;  %v1174_v32 = vld [vmem:[%s1768_s4] ss:$0 sm:$0xff] }
 0x3ac   :  { %1280 = vmatprep.mubr.msk.bf16.mxu0 %vm1480_vm0, %v1479_v0  ;;  %v1012_v47 = vpop.permute.xlu1 %1011 }
 0x3ad   :  { %v666_v38 = vpack.c.bf16 %v665_v34, %v665_v34  ;;  %v1017_v50 = vsel %vm208_vm4, %v1012_v47, 0 }
 0x3ae   :  { %v1381_v39 = vpop.eup %1380 }
 0x3af   :  { %v777_v41 = vmul.f32 %v1381_v39, %v1682_v59  ;;  %v1383_v44 = vpop.eup %1382 }
 0x3b0   :  { %v893_v46 = vmul.f32 %v1383_v44, %v1686_v61 }
 0x3b1   :  { %v778_v43 = vpack.c.bf16 %v777_v41, %v777_v41 }
 0x3b2   :  { %v894_v48 = vpack.c.bf16 %v893_v46, %v893_v46 }
 0x3b8   :  { %v1007_v33 = vpop.xlane.xlu0 %1006 }
 0x3b9   :  { %1384 = vrcp.f32 %v1007_v33 }
 0x3bc   :  { %v668_v35 = vpop.permute.xlu0 %667 }
 0x3bd   :  { %v673_v36 = vsel %vm208_vm4, %v668_v35, 0 }
 0x3be   :  { %1279 = vmatpush3.bf16.msra.mxu0 %v673_v36 }
 0x3bf   :  { %1290 = vmatprep.subr.bf16.mxu0 %v1479_v0 }
 0x3c1   :  { %1281 = vmatmul.mubr.msk.bf16.vlgmr.msra.gmra.mxu0 %vm143_vm2, %v666_v38 }
 0x3c2   :  { %1291 = vmatpush3.bf16.msra.mxu0 %v785_v40  ;;  %1292 = vmatprep.mubr.msk.bf16.mxu0 %vm1480_vm0, %v1479_v0 }
 0x3c3   :  { %1302 = vmatprep.subr.bf16.mxu0 %v1479_v0 }
 0x3c6   :  { %v1385_v49 = vpop.eup %1384 }
 0x3c7   :  { %v1009_v51 = vmul.f32 %v1385_v49, %v1697_v5 }
 0x3c9   :  { %1293 = vmatmul.mubr.msk.bf16.vlgmr.msra.gmra.mxu0 %vm143_vm2, %v778_v43  ;;  %v1010_v52 = vpack.c.bf16 %v1009_v51, %v1009_v51 }
 0x3ca   :  { %1303 = vmatpush3.bf16.msra.mxu0 %v901_v45  ;;  %1304 = vmatprep.mubr.msk.bf16.mxu0 %vm1480_vm0, %v1479_v0 }
 0x3cb   :  { %1314 = vmatprep.subr.bf16.mxu0 %v1479_v0 }
 0x3d1   :  { %1305 = vmatmul.mubr.msk.bf16.vlgmr.msra.gmra.mxu0 %vm143_vm2, %v894_v48 }
 0x3d2   :  { %1315 = vmatpush3.bf16.msra.mxu0 %v1017_v50  ;;  %1316 = vmatprep.mubr.msk.bf16.mxu0 %vm1480_vm0, %v1479_v0 }
 0x3d9   :  { %1317 = vmatmul.mubr.msk.bf16.vlgmr.msra.gmra.mxu0 %vm143_vm2, %v1010_v52 }
 0x42e   :  { %v246_v53 = vpop.f32.mrf.mxu0 }
 0x42f   :  { %252 = vst.msk [vmem:[#allocation2] sm:$0xff] %vm143_vm2, %v246_v53 }
 0x430   :  { %v1234_v54 = vpop.f32.mrf.mxu0 }
 0x432   :  { %v249_v55 = vpop.f32.mrf.mxu0 }
 0x434   :  { %v1235_v56 = vpop.f32.mrf.mxu0 }
 0x436   :  { %v358_v10 = vpop.f32.mrf.mxu0 }
 0x437   :  { %365 = vrot.lane.b32.xlu1 %v358_v10, %s1477_s29 }
 0x438   :  { %v1246_v57 = vpop.f32.mrf.mxu0 }
 0x43a   :  { %v361_v58 = vpop.f32.mrf.mxu0 }
 0x43c   :  { %v1247_v59 = vpop.f32.mrf.mxu0 }
 0x43e   :  { %v475_v60 = vpop.f32.mrf.mxu0 }
 0x43f   :  { %482 = vrot.lane.b32.xlu0 %v475_v60, %s1491_s20 }
 0x440   :  { %v1258_v61 = vpop.f32.mrf.mxu0 }
 0x442   :  { %v478_v62 = vpop.f32.mrf.mxu0 }
 0x444   :  { %v1259_v63 = vpop.f32.mrf.mxu0 }
 0x46b   :  { %v592_v1 = vpop.f32.mrf.mxu0 }
 0x46c   :  { %599 = vrot.lane.b32.xlu0 %v592_v1, %s1492_s21 }
 0x46d   :  { %v1270_v2 = vpop.f32.mrf.mxu0 }
 0x46f   :  { %v595_v3 = vpop.f32.mrf.mxu0 }
 0x471   :  { %v1271_v4 = vpop.f32.mrf.mxu0 }
 0x481   :  { %v709_v5 = vpop.f32.mrf.mxu0 }
 0x482   :  { %715 = vst.msk [vmem:[#allocation2 + $0x8] sm:$0xff] %vm143_vm2, %v709_v5 }
 0x483   :  { %v1282_v6 = vpop.f32.mrf.mxu0 }
 0x485   :  { %v712_v7 = vpop.f32.mrf.mxu0 }
 0x487   :  { %v1283_v8 = vpop.f32.mrf.mxu0 }
 0x489   :  { %v821_v9 = vpop.f32.mrf.mxu0 }
 0x48a   :  { %828 = vrot.lane.b32.xlu1 %v821_v9, %s1477_s29 }
 0x48b   :  { %v1294_v11 = vpop.f32.mrf.mxu0 }
 0x48d   :  { %v824_v12 = vpop.f32.mrf.mxu0 }
 0x48f   :  { %v1295_v15 = vpop.f32.mrf.mxu0 }
 0x491   :  { %v937_v16 = vpop.f32.mrf.mxu0 }
 0x492   :  { %944 = vrot.lane.b32.xlu1 %v937_v16, %s1491_s20 }
 0x493   :  { %v1306_v17 = vpop.f32.mrf.mxu0 }
 0x495   :  { %v940_v18 = vpop.f32.mrf.mxu0 }
 0x497   :  { %v1307_v19 = vpop.f32.mrf.mxu0 }
 0x499   :  { %v1053_v20 = vpop.f32.mrf.mxu0 }
 0x49a   :  { %1060 = vrot.lane.b32.xlu1 %v1053_v20, %s1492_s21 }
 0x49b   :  { %v1318_v21 = vpop.f32.mrf.mxu0 }
 0x49d   :  { %v1056_v22 = vpop.f32.mrf.mxu0 }
 0x49f   :  { %v1319_v23 = vpop.f32.mrf.mxu0 }
 0x4a9   :  { %v366_v24 = vpop.permute.xlu1 %365 }
 0x4aa   :  { %369 = vst.msk [vmem:[#allocation2] sm:$0xff] %vm368_vm5, %v366_v24 }
 0x4b1   :  { %v483_v25 = vpop.permute.xlu0 %482 }
 0x4b2   :  { %486 = vst.msk [vmem:[#allocation2] sm:$0xff] %vm485_vm6, %v483_v25 }
 0x4de   :  { %v600_v26 = vpop.permute.xlu0 %599 }
 0x4df   :  { %603 = vst.msk [vmem:[#allocation2] sm:$0xff] %vm602_vm7, %v600_v26 }
 0x4e6   :  { %v1064_v29 = vld [vmem:[#allocation2] sm:$0xff] }
 0x4fc   :  { %v829_v0 = vpop.permute.xlu1 %828 }
 0x4fd   :  { %831 = vst.msk [vmem:[#allocation2 + $0x8] sm:$0xff] %vm368_vm5, %v829_v0 }
 0x504   :  { %v945_v27 = vpop.permute.xlu1 %944 }
 0x505   :  { %947 = vst.msk [vmem:[#allocation2 + $0x8] sm:$0xff] %vm485_vm6, %v945_v27 }
 0x50c   :  { %v1061_v28 = vpop.permute.xlu1 %1060 }
 0x50d   :  { %1063 = vst.msk [vmem:[#allocation2 + $0x8] sm:$0xff] %vm602_vm7, %v1061_v28 }
 0x514   :  { %v1065_v30 = vld [vmem:[#allocation2 + $0x8] sm:$0xff] }
 0x515   :  { %v1066_v31 = vpack.c.bf16 %v1065_v30, %v1064_v29 }
 0x517   :  { %1325 = vmatmul.mubr.msk.bf16.vlgmr.msra.gmra.mxu1 %vm89_vm1, %v1066_v31 }
 0x5d7   :  { %v1127_v33 = vpop.f32.mrf.mxu1 }
 0x5d8   :  { %v1128_v34 = vadd.f32 %v1174_v32, %v1127_v33 }
 0x5d9   :  { %v1326_v35 = vpop.f32.mrf.mxu1 }
 0x5da   :  { %1134 = vst.msk [vmem:[#allocation9] sm:$0xff] %vm89_vm1, %v1128_v34 }
 0x5db   :  { %v1130_v36 = vpop.f32.mrf.mxu1 }
 0x5dc   :  { %v1131_v37 = vadd.f32 %v1174_v32, %v1130_v36 }
 0x5dd   :  { %v1327_v38 = vpop.f32.mrf.mxu1 }
 0x5de   :  { %1135 = vst.msk [vmem:[#allocation9 + $0x8] sm:$0xff] %vm89_vm1, %v1131_v37 }
 0x5df   :  { %1457 = shalt.err (!%p1454_p5)
}
 0x5e0   :  { %1147 = dma.vmem_to_hbm [thread:$0]  %s1142_s25, 256, %s1769_s5, [#allocation5], %s1476_s28, %s1476_s28, %s1477_s29  }
 0x5e1   :  { %1470 = dma.done.wait [#allocation5], 256  }
 0x5e2   :  { %1471 = vsyncadd [#allocation5], 4294967040 }
 0x5e3   :  { %1151 = vsyncpa [#allocation4], 1 }
 0x5e4   :  { %1152 = vsyncpa [#allocation7], 1 }
 0x5e5   :  { %1153 = vsyncpa [#allocation5], 1 }

</bundles_post_ra>
